<compile_context>
chip_gen: v5e
topology: v5e:2x2
jax: 0.10.0
libtpu: 0.0.40
codegen_flags: <defaults>
</compile_context>

<pallas_src>
import jax
import jax.numpy as jnp
from jax.experimental import pallas as pl
from jax.experimental.pallas import tpu as pltpu


def _fused_heads_kernel(x_ref, w_ref, b_ref, out_ref):
    # x_ref: (TM, F), w_ref: (F, OUT_PAD) [already (in, out) layout],
    # b_ref: (1, OUT_PAD), out_ref: (TM, OUT_PAD) -- OUT_PAD is a multiple of 128.
    acc = jnp.dot(x_ref[...], w_ref[...], preferred_element_type=jnp.float32)
    acc = acc + b_ref[...].astype(jnp.float32)
    out_ref[...] = acc.astype(out_ref.dtype)


def output_layer(x, w_reg, b_reg, w_ext=None, b_ext=None, tm=None):
    """Pallas equivalent of OutputLayer.forward.

    x:      (B, F) float32
    w_reg:  (out_reg, F)   PyTorch nn.Linear layout (out, in)
    b_reg:  (out_reg,)
    w_ext:  (num_extra, F) or None   (num_extra == 0 path)
    b_ext:  (num_extra,)  or None
    Returns (regular_outputs, extra_outputs); extra_outputs is None when the
    extra head is absent, matching the PyTorch module.
    """
    B, F = x.shape
    out_reg = w_reg.shape[0]

    if w_ext is not None:
        num_extra = w_ext.shape[0]
        w_all = jnp.concatenate([w_reg, w_ext], axis=0)  # (out_total, F)
        b_all = jnp.concatenate([b_reg, b_ext], axis=0)  # (out_total,)
    else:
        num_extra = 0
        w_all = w_reg
        b_all = b_reg
    out_total = out_reg + num_extra

    # Pad the fused output dimension to a multiple of 128 -> unmasked lane-dense stores.
    out_pad = ((out_total + 127) // 128) * 128
    if out_pad != out_total:
        w_all = jnp.pad(w_all, ((0, out_pad - out_total), (0, 0)))
        b_all = jnp.pad(b_all, ((0, out_pad - out_total),))

    # One-time XLA-level transpose to (in, out) so the kernel is a plain x @ w.
    w_all_t = jnp.transpose(w_all)          # (F, out_pad)
    b_all_2d = b_all.reshape(1, out_pad)    # (1, out_pad)

    # Batch tile: multiple of 8 sublanes, capped so large B still pipelines.
    if tm is None:
        tm = min(512, ((B + 7) // 8) * 8)
    tm = max(8, (tm // 8) * 8)
    b_pad = ((B + tm - 1) // tm) * tm
    x_p = jnp.pad(x, ((0, b_pad - B), (0, 0))) if b_pad != B else x

    grid = (b_pad // tm,)

    out = pl.pallas_call(
        _fused_heads_kernel,
        out_shape=jax.ShapeDtypeStruct((b_pad, out_pad), x.dtype),
        grid_spec=pltpu.PrefetchScalarGridSpec(
            num_scalar_prefetch=0,
            grid=grid,
            in_specs=[
                pl.BlockSpec((tm, F), lambda i: (i, 0)),        # x: streams per step
                pl.BlockSpec((F, out_pad), lambda i: (0, 0)),   # fused weight: resident
                pl.BlockSpec((1, out_pad), lambda i: (0, 0)),   # fused bias: resident
            ],
            out_specs=pl.BlockSpec((tm, out_pad), lambda i: (i, 0)),
        ),
        compiler_params=pltpu.CompilerParams(
            dimension_semantics=("parallel",),  # shards the batch axis across TCs on v7x
        ),
    )(x_p, w_all_t, b_all_2d)

    out = out[:B]
    reg = out[:, :out_reg]
    ext = out[:, out_reg:out_total] if num_extra > 0 else None
    return reg, ext


if __name__ == "__main__":
    # Small shapes consistent with the module: fc = Linear(in=32, out=16), num_extra=4.
    B, F, OUT_REG, NUM_EXTRA = 8, 32, 16, 4

    key = jax.random.PRNGKey(0)
    k_x, k_wr, k_br, k_we, k_be = jax.random.split(key, 5)

    x = jax.random.normal(k_x, (B, F), dtype=jnp.float32)
    # PyTorch nn.Linear layout: weight is (out, in), bias is (out,).
    w_reg = jax.random.normal(k_wr, (OUT_REG, F), dtype=jnp.float32) * 0.05
    b_reg = jax.random.normal(k_br, (OUT_REG,), dtype=jnp.float32) * 0.05
    w_ext = jax.random.normal(k_we, (NUM_EXTRA, F), dtype=jnp.float32) * 0.05
    b_ext = jax.random.normal(k_be, (NUM_EXTRA,), dtype=jnp.float32) * 0.05

    reg_out, ext_out = output_layer(x, w_reg, b_reg, w_ext, b_ext)
    reg_out = jax.block_until_ready(reg_out)
    ext_out = jax.block_until_ready(ext_out)

    # Pure-JAX reference (nn.Linear semantics: y = x @ W.T + b).
    reg_ref = x @ w_reg.T + b_reg
    ext_ref = x @ w_ext.T + b_ext
    assert reg_out.shape == (B, OUT_REG) and ext_out.shape == (B, NUM_EXTRA)
    assert jnp.allclose(reg_out, reg_ref, atol=1e-5, rtol=1e-5)
    assert jnp.allclose(ext_out, ext_ref, atol=1e-5, rtol=1e-5)

    # num_extra == 0 path: extra_outputs must be None.
    reg_only, none_out = output_layer(x, w_reg, b_reg)
    reg_only = jax.block_until_ready(reg_only)
    assert none_out is None
    assert jnp.allclose(reg_only, reg_ref, atol=1e-5, rtol=1e-5)

    # Exercise a non-trivial grid (B larger than one tile, non-multiple of 8).
    B2 = 37
    x2 = jax.random.normal(jax.random.PRNGKey(1), (B2, F), dtype=jnp.float32)
    reg2, ext2 = output_layer(x2, w_reg, b_reg, w_ext, b_ext, tm=8)
    reg2 = jax.block_until_ready(reg2)
    ext2 = jax.block_until_ready(ext2)
    assert jnp.allclose(reg2, x2 @ w_reg.T + b_reg, atol=1e-5, rtol=1e-5)
    assert jnp.allclose(ext2, x2 @ w_ext.T + b_ext, atol=1e-5, rtol=1e-5)

    print("KERNEL_OK")
</pallas_src>

<mosaic_0001>
module attributes {stable_mosaic.version = 11 : i64} {
  func.func @_fused_heads_kernel(%arg0: i32, %arg1: memref<8x32xf32, #tpu.memory_space<vmem>>, %arg2: memref<32x128xf32, #tpu.memory_space<vmem>>, %arg3: memref<1x128xf32, #tpu.memory_space<vmem>>, %arg4: memref<8x128xf32, #tpu.memory_space<vmem>>) attributes {dimension_semantics = [#tpu.dimension_semantics<parallel>], iteration_bounds = array<i64: 1>, scalar_prefetch = 0 : i64, scratch_operands = 0 : i64, tpu.core_type = #tpu.core_type<tc>, window_params = [{transform_indices = @transform_0, window_bounds = array<i64: 8, 32>}, {pipeline_mode = #tpu.pipeline_mode<synchronous>, transform_indices = @transform_1, window_bounds = array<i64: 32, 128>}, {pipeline_mode = #tpu.pipeline_mode<synchronous>, transform_indices = @transform_2, window_bounds = array<i64: 1, 128>}, {transform_indices = @transform_3, window_bounds = array<i64: 8, 128>}]} {
    %c0 = arith.constant 0 : index
    %c0_0 = arith.constant 0 : index
    %0 = vector.load %arg1[%c0, %c0_0] : memref<8x32xf32, #tpu.memory_space<vmem>>, vector<8x32xf32>
    %c0_1 = arith.constant 0 : index
    %c0_2 = arith.constant 0 : index
    %1 = vector.load %arg2[%c0_1, %c0_2] : memref<32x128xf32, #tpu.memory_space<vmem>>, vector<32x128xf32>
    %cst = arith.constant dense<0.000000e+00> : vector<8x128xf32>
    %2 = tpu.matmul %0, %1, %cst {dimension_numbers = #tpu.dot_dimension_numbers<[1], [0], [0], [1], [0, 0, 1, 1], [], []>} : vector<8x32xf32>, vector<32x128xf32>, vector<8x128xf32> -> vector<8x128xf32>
    %c0_3 = arith.constant 0 : index
    %c0_4 = arith.constant 0 : index
    %3 = vector.load %arg3[%c0_3, %c0_4] : memref<1x128xf32, #tpu.memory_space<vmem>>, vector<1x128xf32>
    %4 = vector.broadcast %3 : vector<1x128xf32> to vector<8x128xf32>
    %5 = arith.addf %2, %4 : vector<8x128xf32>
    %c0_5 = arith.constant 0 : index
    %c0_6 = arith.constant 0 : index
    %6 = vector.load %arg4[%c0_5, %c0_6] : memref<8x128xf32, #tpu.memory_space<vmem>>, vector<8x128xf32>
    tpu.vector_store %arg4[%c0_5, %c0_6], %5 {strides = array<i32>} : memref<8x128xf32, #tpu.memory_space<vmem>>, vector<8x128xf32>,
    return
  }
  func.func @transform_0(%arg0: i32) -> (i32, i32) {
    %c0_i32 = arith.constant 0 : i32
    %c0_i32_0 = arith.constant 0 : i32
    return %arg0, %c0_i32 : i32, i32
  }
  func.func @transform_1(%arg0: i32) -> (i32, i32) {
    %c0_i32 = arith.constant 0 : i32
    %c0_i32_0 = arith.constant 0 : i32
    %c0_i32_1 = arith.constant 0 : i32
    return %c0_i32, %c0_i32_0 : i32, i32
  }
  func.func @transform_2(%arg0: i32) -> (i32, i32) {
    %c0_i32 = arith.constant 0 : i32
    %c0_i32_0 = arith.constant 0 : i32
    %c0_i32_1 = arith.constant 0 : i32
    return %c0_i32, %c0_i32_0 : i32, i32
  }
  func.func @transform_3(%arg0: i32) -> (i32, i32) {
    %c0_i32 = arith.constant 0 : i32
    %c0_i32_0 = arith.constant 0 : i32
    return %arg0, %c0_i32 : i32, i32
  }
}

</mosaic_0001>

<bundles_post_ra>
// kernel: tpu_custom_call.1
= control target key start
LH: loop header
LB: loop body
LE: loop exit
PB: predicated region body
PF: predicated region fallthrough
CT: control target
= control target key end

     0   :  { %8 = vsyncpa [#allocation3], 0  ;;  %s219_s0 = inlined_call_operand.hbm [shape: f32[8,32], index: 0, kind: input, shape index: {}]   ;;  %s220_s1 = inlined_call_operand.hbm [shape: f32[32,128], index: 1, kind: input, shape index: {}]   ;;  %s221_s2 = inlined_call_operand.vmem [shape: f32[1,128], index: 2, kind: input, shape index: {}]   ;;  %s222_s3 = inlined_call_operand.hbm [shape: f32[8,128], index: 3, kind: output, shape index: {}]  }
   0x1   :  { %9 = vsyncpa [#allocation6], 0 }
   0x2   :  { %10 = vsyncpa [#allocation4], 0  ;;  %s16_s14 = sshll.u32 %s219_s0, 4  ;;  %s182_s15 = smov [#allocation2]   ;;  %s17_s14 = int_to_ptr.hbm [resolvable:$true] %s16_s14 }
   0x3   :  { %s18_s16 = sshll.u32 %s182_s15, 4  ;;  %s26_s19 = sshll.u32 %s220_s1, 4  ;;  %s19_s16 = int_to_ptr.vmem [resolvable:$true] %s18_s16  ;;  %s27_s19 = int_to_ptr.hbm [resolvable:$true] %s26_s19 }
   0x4   :  { %21 = dma.hbm_to_vmem [thread:$0]  %s17_s14, 128, %s19_s16, [#allocation3]  }
   0x5   :  { %s183_s20 = smov [#allocation5]   ;;  %s184_s22 = smov 128  }
   0x6   :  { %s28_s21 = sshll.u32 %s183_s20, 4  ;;  %s185_s23 = smov 8   ;;  %s29_s21 = int_to_ptr.vmem [resolvable:$true] %s28_s21 }
   0x7   :  { %34 = dma.hbm_to_vmem [thread:$0]  %s27_s19, 512, %s29_s21, [#allocation6], %s184_s22, %s184_s22, %s185_s23  }
   0x8   :  { %176 = dma.done.wait [#allocation3], 128  }
   0x9   :  { %177 = vsyncadd [#allocation3], 4294967168 }
   0xa   :  { %178 = dma.done.wait [#allocation6], 512  }
   0xb   :  { %179 = vsyncadd [#allocation6], 4294966784  ;;  %v49_v0 = vld [vmem:[#allocation5 + $0x18] sm:$0xff]  ;;  %v48_v1 = vld [vmem:[#allocation5 + $0x10] sm:$0xff]  ;;  %vm54_vm0 = vcmask 261120   ;;  %s186_s24 = smov [#allocation7]  }
   0xc   :  { %70 = vmatpush.msra.mxu0 %v49_v0  ;;  %v47_v2 = vld [vmem:[#allocation5 + $0x8] sm:$0xff]  ;;  %v46_v3 = vld [vmem:[#allocation5] sm:$0xff]  ;;  %v45_v4 = vld [vmem:[#allocation2] sm:$0xff]  ;;  %s84_s25 = sshll.u32 %s186_s24, 4  ;;  %s86_s28 = sshll.u32 %s222_s3, 4  ;;  %s85_s25 = int_to_ptr.vmem [resolvable:$true] %s84_s25  ;;  %s87_s28 = int_to_ptr.hbm [resolvable:$true] %s86_s28 }
   0xd   :  { %v103_v5 = vld [vmem:[%s221_s2] ss:$0 sm:$0xff] }
   0xe   :  { %71 = vmatpush.msra.mxu0 %v48_v1 }
  0x10   :  { %72 = vmatpush.msra.mxu0 %v47_v2 }
  0x12   :  { %73 = vmatpush.msra.mxu0 %v46_v3 }
  0x13   :  { %97 = vmatmul.msk.f32.vlgmr.msra.gmra.mxu0 %vm54_vm0, %v45_v4 }
  0x90   :  { %v75_v6 = vpop.f32.mrf.mxu0 }
  0x91   :  { %v76_v7 = vadd.f32 %v103_v5, %v75_v6 }
  0x93   :  { %78 = vst [vmem:[#allocation7] sm:$0xff] %v76_v7 }
  0x94   :  { %89 = dma.vmem_to_hbm [thread:$0]  %s85_s25, 128, %s87_s28, [#allocation4]  }
  0x95   :  { %180 = dma.done.wait [#allocation4], 128  }
  0x96   :  { %181 = vsyncadd [#allocation4], 4294967168 }
  0x97   :  { %94 = vsyncpa [#allocation3], 1 }
  0x98   :  { %95 = vsyncpa [#allocation6], 1 }
  0x99   :  { %96 = vsyncpa [#allocation4], 1 }

</bundles_post_ra>
